<compile_context>
chip_gen: v7x
topology: tpu7x:2x2x1
jax: 0.10.0
libtpu: 0.0.40
codegen_flags: <defaults>
</compile_context>

<pallas_src>
import math
import functools

import jax
import jax.numpy as jnp
from jax import lax
from jax.experimental import pallas as pl
from jax.experimental.pallas import tpu as pltpu

D_MODEL = 32
NUM_HEADS = 4
D_HEAD = D_MODEL // NUM_HEADS
D_FF = 4 * D_MODEL
BATCH = 2
SEQ = 8
LN_EPS = 1e-5


def _layer_norm(x, gamma, beta):
    mean = jnp.mean(x, axis=-1, keepdims=True)
    var = jnp.mean((x - mean) ** 2, axis=-1, keepdims=True)
    return (x - mean) * lax.rsqrt(var + LN_EPS) * gamma + beta


def _gelu(x):
    # exact (erf) GELU, matches torch.nn.GELU() default
    return 0.5 * x * (1.0 + lax.erf(x / math.sqrt(2.0)))


def encoder_layer_kernel(x_ref, wpack_ref, w2_ref, out_ref, *, batch, num_heads):
    """Single invocation: full (B*S, D) slab + all packed weights resident in VMEM.

    wpack layout (rows x 128 lanes, f32):
      rows [0, d)        : [ Wq*scale | Wk | Wv | Wo ]   (d x 4d)
      rows [d, 2d)       : W1                            (d x 4d)
      row  2d   [:d]     : LN1 gamma
      row  2d+1 [:d]     : LN1 beta
      row  2d+2 [:d]     : LN2 gamma
      row  2d+3 [:d]     : LN2 beta
      row  2d+4 [:4d]    : MLP b1
      row  2d+5 [:d]     : MLP b2
    """
    bs, d = x_ref.shape                      # (B*S, D)
    seq = bs // batch
    d_head = d // num_heads

    # ---- unpack weights via static ref slices (free) ----
    wqkv = wpack_ref[0:d, 0:3 * d]           # (D, 3D), Wq already pre-scaled
    wo = wpack_ref[0:d, 3 * d:4 * d]         # (D, D)
    w1 = wpack_ref[d:2 * d, :]               # (D, 4D)
    g1 = wpack_ref[2 * d + 0:2 * d + 1, 0:d]
    be1 = wpack_ref[2 * d + 1:2 * d + 2, 0:d]
    g2 = wpack_ref[2 * d + 2:2 * d + 3, 0:d]
    be2 = wpack_ref[2 * d + 3:2 * d + 4, 0:d]
    b1 = wpack_ref[2 * d + 4:2 * d + 5, :]   # (1, 4D)
    b2 = wpack_ref[2 * d + 5:2 * d + 6, 0:d]  # (1, D)

    x = x_ref[...].astype(jnp.float32)       # (B*S, D)

    # ---- norm1 + fused QKV projection (ONE MXU push) ----
    n1 = _layer_norm(x, g1, be1)
    qkv = jnp.dot(n1, wqkv, preferred_element_type=jnp.float32)   # (B*S, 3D)

    # ---- stack heads into the leading batch dim: (B*H, S, Dh), n = h*B + b ----
    def stack(base):
        return jnp.concatenate(
            [qkv[:, base + h * d_head: base + (h + 1) * d_head]
             .reshape(batch, seq, d_head) for h in range(num_heads)],
            axis=0)

    q = stack(0)          # already scaled by 1/sqrt(Dh) via Wq
    k = stack(d)
    v = stack(2 * d)

    # ---- attention: one QK einsum, one fused softmax, one PV einsum ----
    s = jnp.einsum('nqd,nkd->nqk', q, k,
                   preferred_element_type=jnp.float32)            # (B*H, S, S)
    s = s - jnp.max(s, axis=-1, keepdims=True)                    # stable softmax
    p = jnp.exp(s)
    p = p * pl.reciprocal(jnp.sum(p, axis=-1, keepdims=True), approx=False)
    o = jnp.einsum('nqk,nkd->nqd', p, v,
                   preferred_element_type=jnp.float32)            # (B*H, S, Dh)

    # ---- merge heads back to (B*S, D) and apply W_O with ONE matmul + residual ----
    o_merged = jnp.concatenate(
        [o[h * batch:(h + 1) * batch].reshape(bs, d_head) for h in range(num_heads)],
        axis=-1)                                                   # (B*S, D)
    att = x + jnp.dot(o_merged, wo, preferred_element_type=jnp.float32)

    # ---- norm2 + MLP (h1 is a 128-lane-dense slab) ----
    n2 = _layer_norm(att, g2, be2)
    h1 = jnp.dot(n2, w1, preferred_element_type=jnp.float32) + b1
    h2 = jnp.dot(_gelu(h1), w2_ref[...], preferred_element_type=jnp.float32) + b2

    out_ref[...] = (h2 + att).astype(out_ref.dtype)  # residual 2, single store


@jax.jit
def encoder_layer(x, wpack, w2):
    B, S, D = x.shape
    bs = B * S
    kernel = functools.partial(encoder_layer_kernel, batch=B, num_heads=NUM_HEADS)
    vmem_spec = pl.BlockSpec(memory_space=pltpu.MemorySpace.VMEM)

    out = pl.pallas_call(
        kernel,
        out_shape=jax.ShapeDtypeStruct((bs, D), x.dtype),
        in_specs=[vmem_spec, vmem_spec, vmem_spec],
        out_specs=vmem_spec,
    )(x.reshape(bs, D), wpack, w2)
    return out.reshape(B, S, D)


def _xavier_uniform(key, shape):
    fan_in, fan_out = shape
    a = math.sqrt(6.0 / (fan_in + fan_out))
    return jax.random.uniform(key, shape, jnp.float32, minval=-a, maxval=a)


def make_params(key):
    """Raw parameters mirroring the PyTorch module."""
    ks = jax.random.split(key, 6)
    wq = _xavier_uniform(ks[0], (D_MODEL, D_MODEL))
    wk = _xavier_uniform(ks[1], (D_MODEL, D_MODEL))
    wv = _xavier_uniform(ks[2], (D_MODEL, D_MODEL))
    wo = _xavier_uniform(ks[3], (D_MODEL, D_MODEL))
    g1 = jnp.ones((D_MODEL,), jnp.float32)
    be1 = jnp.zeros((D_MODEL,), jnp.float32)
    g2 = jnp.ones((D_MODEL,), jnp.float32)
    be2 = jnp.zeros((D_MODEL,), jnp.float32)
    w1 = _xavier_uniform(ks[4], (D_MODEL, D_FF))
    b1 = jnp.zeros((D_FF,), jnp.float32)
    w2 = _xavier_uniform(ks[5], (D_FF, D_MODEL))
    b2 = jnp.zeros((D_MODEL,), jnp.float32)
    return (wq, wk, wv, wo, g1, be1, g2, be2, w1, b1, w2, b2)


def pack_params(params):
    """Host-side, one-time packing: fold 1/sqrt(Dh) into Wq, fuse all small operands."""
    wq, wk, wv, wo, g1, be1, g2, be2, w1, b1, w2, b2 = params
    d = wq.shape[0]
    d_ff = w1.shape[1]
    assert d_ff == 4 * d, "packing layout assumes d_ff == 4*d"
    scale = 1.0 / math.sqrt(d // NUM_HEADS)

    wqkv_wo = jnp.concatenate([wq * scale, wk, wv, wo], axis=1)   # (D, 4D)
    small = jnp.zeros((8, d_ff), jnp.float32)
    small = small.at[0, :d].set(g1).at[1, :d].set(be1)
    small = small.at[2, :d].set(g2).at[3, :d].set(be2)
    small = small.at[4, :].set(b1).at[5, :d].set(b2)
    wpack = jnp.concatenate([wqkv_wo, w1, small], axis=0)         # (2D+8, 4D) = (72, 128)
    return wpack, w2


def encoder_layer_ref(x, params):
    """Pure-JAX reference mirroring the PyTorch forward (unscaled raw weights)."""
    wq, wk, wv, wo, g1, be1, g2, be2, w1, b1, w2, b2 = params
    B, S, D = x.shape

    n1 = _layer_norm(x, g1, be1)
    q, k, v = n1 @ wq, n1 @ wk, n1 @ wv

    def split(t):
        return t.reshape(B, S, NUM_HEADS, D_HEAD).transpose(0, 2, 1, 3)

    qh, kh, vh = split(q), split(k), split(v)
    s = (qh @ kh.transpose(0, 1, 3, 2)) / math.sqrt(D_HEAD)
    p = jax.nn.softmax(s, axis=-1)
    o = (p @ vh).transpose(0, 2, 1, 3).reshape(B, S, D)
    att = o @ wo + x
    n2 = _layer_norm(att, g2, be2)
    h1 = n2 @ w1 + b1
    return _gelu(h1) @ w2 + b2 + att


if __name__ == "__main__":
    key = jax.random.PRNGKey(0)
    pkey, xkey = jax.random.split(key)
    params = make_params(pkey)
    wpack, w2 = pack_params(params)
    x = jax.random.normal(xkey, (BATCH, SEQ, D_MODEL), jnp.float32)

    out = jax.block_until_ready(encoder_layer(x, wpack, w2))
    ref = encoder_layer_ref(x, params)

    assert out.shape == (BATCH, SEQ, D_MODEL)
    assert jnp.allclose(out, ref, rtol=1e-4, atol=1e-4), "mismatch vs reference"
    print("KERNEL_OK")
</pallas_src>

<mosaic_0001>
module attributes {stable_mosaic.version = 11 : i64} {
  func.func @encoder_layer_kernel(%arg0: memref<16x32xf32, #tpu.memory_space<vmem>>, %arg1: memref<72x128xf32, #tpu.memory_space<vmem>>, %arg2: memref<128x32xf32, #tpu.memory_space<vmem>>, %arg3: memref<16x32xf32, #tpu.memory_space<vmem>>) attributes {dimension_semantics = [], scalar_prefetch = 0 : i64, scratch_operands = 0 : i64, tpu.core_type = #tpu.core_type<tc>} {
    %c0 = arith.constant 0 : index
    %c0_0 = arith.constant 0 : index
    %0 = vector.load %arg1[%c0, %c0_0] : memref<72x128xf32, #tpu.memory_space<vmem>>, vector<32x96xf32>
    %c0_1 = arith.constant 0 : index
    %c96 = arith.constant 96 : index
    %1 = vector.load %arg1[%c0_1, %c96] : memref<72x128xf32, #tpu.memory_space<vmem>>, vector<32x32xf32>
    %c32 = arith.constant 32 : index
    %c0_2 = arith.constant 0 : index
    %2 = vector.load %arg1[%c32, %c0_2] : memref<72x128xf32, #tpu.memory_space<vmem>>, vector<32x128xf32>
    %c64 = arith.constant 64 : index
    %c0_3 = arith.constant 0 : index
    %3 = vector.load %arg1[%c64, %c0_3] : memref<72x128xf32, #tpu.memory_space<vmem>>, vector<1x32xf32>
    %c65 = arith.constant 65 : index
    %c0_4 = arith.constant 0 : index
    %4 = vector.load %arg1[%c65, %c0_4] : memref<72x128xf32, #tpu.memory_space<vmem>>, vector<1x32xf32>
    %c66 = arith.constant 66 : index
    %c0_5 = arith.constant 0 : index
    %5 = vector.load %arg1[%c66, %c0_5] : memref<72x128xf32, #tpu.memory_space<vmem>>, vector<1x32xf32>
    %c67 = arith.constant 67 : index
    %c0_6 = arith.constant 0 : index
    %6 = vector.load %arg1[%c67, %c0_6] : memref<72x128xf32, #tpu.memory_space<vmem>>, vector<1x32xf32>
    %c68 = arith.constant 68 : index
    %c0_7 = arith.constant 0 : index
    %7 = vector.load %arg1[%c68, %c0_7] : memref<72x128xf32, #tpu.memory_space<vmem>>, vector<1x128xf32>
    %c69 = arith.constant 69 : index
    %c0_8 = arith.constant 0 : index
    %8 = vector.load %arg1[%c69, %c0_8] : memref<72x128xf32, #tpu.memory_space<vmem>>, vector<1x32xf32>
    %c0_9 = arith.constant 0 : index
    %c0_10 = arith.constant 0 : index
    %9 = vector.load %arg0[%c0_9, %c0_10] : memref<16x32xf32, #tpu.memory_space<vmem>>, vector<16x32xf32>
    %cst = arith.constant dense<0.000000e+00> : vector<16xf32>
    %10 = vector.multi_reduction <add>, %9, %cst [1] : vector<16x32xf32> to vector<16xf32>
    %11 = vector.shape_cast %10 : vector<16xf32> to vector<16x1xf32>
    %cst_11 = arith.constant 3.200000e+01 : f32
    %12 = vector.broadcast %cst_11 : f32 to vector<16x1xf32>
    %13 = arith.divf %11, %12 : vector<16x1xf32>
    %14 = vector.broadcast %13 : vector<16x1xf32> to vector<16x32xf32>
    %15 = arith.subf %9, %14 : vector<16x32xf32>
    %16 = arith.mulf %15, %15 : vector<16x32xf32>
    %cst_12 = arith.constant dense<0.000000e+00> : vector<16xf32>
    %17 = vector.multi_reduction <add>, %16, %cst_12 [1] : vector<16x32xf32> to vector<16xf32>
    %18 = vector.shape_cast %17 : vector<16xf32> to vector<16x1xf32>
    %cst_13 = arith.constant 3.200000e+01 : f32
    %19 = vector.broadcast %cst_13 : f32 to vector<16x1xf32>
    %20 = arith.divf %18, %19 : vector<16x1xf32>
    %21 = vector.broadcast %13 : vector<16x1xf32> to vector<16x32xf32>
    %22 = arith.subf %9, %21 : vector<16x32xf32>
    %cst_14 = arith.constant 9.99999974E-6 : f32
    %23 = vector.broadcast %cst_14 : f32 to vector<16x1xf32>
    %24 = arith.addf %20, %23 : vector<16x1xf32>
    %25 = math.rsqrt %24 : vector<16x1xf32>
    %26 = vector.broadcast %25 : vector<16x1xf32> to vector<16x32xf32>
    %27 = arith.mulf %22, %26 : vector<16x32xf32>
    %28 = vector.broadcast %3 : vector<1x32xf32> to vector<16x32xf32>
    %29 = arith.mulf %27, %28 : vector<16x32xf32>
    %30 = vector.broadcast %4 : vector<1x32xf32> to vector<16x32xf32>
    %31 = arith.addf %29, %30 : vector<16x32xf32>
    %cst_15 = arith.constant dense<0.000000e+00> : vector<16x96xf32>
    %32 = tpu.matmul %31, %0, %cst_15 {dimension_numbers = #tpu.dot_dimension_numbers<[1], [0], [0], [1], [0, 0, 1, 1], [], []>} : vector<16x32xf32>, vector<32x96xf32>, vector<16x96xf32> -> vector<16x96xf32>
    %33 = vector.extract_strided_slice %32 {offsets = [0, 0], sizes = [16, 8], strides = [1, 1]} : vector<16x96xf32> to vector<16x8xf32>
    %34 = vector.shape_cast %33 : vector<16x8xf32> to vector<2x8x8xf32>
    %35 = vector.extract_strided_slice %32 {offsets = [0, 8], sizes = [16, 8], strides = [1, 1]} : vector<16x96xf32> to vector<16x8xf32>
    %36 = vector.shape_cast %35 : vector<16x8xf32> to vector<2x8x8xf32>
    %37 = vector.extract_strided_slice %32 {offsets = [0, 16], sizes = [16, 8], strides = [1, 1]} : vector<16x96xf32> to vector<16x8xf32>
    %38 = vector.shape_cast %37 : vector<16x8xf32> to vector<2x8x8xf32>
    %39 = vector.extract_strided_slice %32 {offsets = [0, 24], sizes = [16, 8], strides = [1, 1]} : vector<16x96xf32> to vector<16x8xf32>
    %40 = vector.shape_cast %39 : vector<16x8xf32> to vector<2x8x8xf32>
    %41 = tpu.concatenate %34, %36, %38, %40 in 0 : vector<2x8x8xf32>, vector<2x8x8xf32>, vector<2x8x8xf32>, vector<2x8x8xf32> -> vector<8x8x8xf32>
    %42 = vector.extract_strided_slice %32 {offsets = [0, 32], sizes = [16, 8], strides = [1, 1]} : vector<16x96xf32> to vector<16x8xf32>
    %43 = vector.shape_cast %42 : vector<16x8xf32> to vector<2x8x8xf32>
    %44 = vector.extract_strided_slice %32 {offsets = [0, 40], sizes = [16, 8], strides = [1, 1]} : vector<16x96xf32> to vector<16x8xf32>
    %45 = vector.shape_cast %44 : vector<16x8xf32> to vector<2x8x8xf32>
    %46 = vector.extract_strided_slice %32 {offsets = [0, 48], sizes = [16, 8], strides = [1, 1]} : vector<16x96xf32> to vector<16x8xf32>
    %47 = vector.shape_cast %46 : vector<16x8xf32> to vector<2x8x8xf32>
    %48 = vector.extract_strided_slice %32 {offsets = [0, 56], sizes = [16, 8], strides = [1, 1]} : vector<16x96xf32> to vector<16x8xf32>
    %49 = vector.shape_cast %48 : vector<16x8xf32> to vector<2x8x8xf32>
    %50 = tpu.concatenate %43, %45, %47, %49 in 0 : vector<2x8x8xf32>, vector<2x8x8xf32>, vector<2x8x8xf32>, vector<2x8x8xf32> -> vector<8x8x8xf32>
    %51 = vector.extract_strided_slice %32 {offsets = [0, 64], sizes = [16, 8], strides = [1, 1]} : vector<16x96xf32> to vector<16x8xf32>
    %52 = vector.shape_cast %51 : vector<16x8xf32> to vector<2x8x8xf32>
    %53 = vector.extract_strided_slice %32 {offsets = [0, 72], sizes = [16, 8], strides = [1, 1]} : vector<16x96xf32> to vector<16x8xf32>
    %54 = vector.shape_cast %53 : vector<16x8xf32> to vector<2x8x8xf32>
    %55 = vector.extract_strided_slice %32 {offsets = [0, 80], sizes = [16, 8], strides = [1, 1]} : vector<16x96xf32> to vector<16x8xf32>
    %56 = vector.shape_cast %55 : vector<16x8xf32> to vector<2x8x8xf32>
    %57 = vector.extract_strided_slice %32 {offsets = [0, 88], sizes = [16, 8], strides = [1, 1]} : vector<16x96xf32> to vector<16x8xf32>
    %58 = vector.shape_cast %57 : vector<16x8xf32> to vector<2x8x8xf32>
    %59 = tpu.concatenate %52, %54, %56, %58 in 0 : vector<2x8x8xf32>, vector<2x8x8xf32>, vector<2x8x8xf32>, vector<2x8x8xf32> -> vector<8x8x8xf32>
    "tpu.trace_start"() <{level = 10 : i32, message = "nqd,nkd->nqk"}> : () -> ()
    %cst_16 = arith.constant dense<0.000000e+00> : vector<8x8x8xf32>
    %60 = tpu.matmul %41, %50, %cst_16 {dimension_numbers = #tpu.dot_dimension_numbers<[2], [2], [1], [1], [0, 0, 0, 1, 1, 1], [0], [0]>} : vector<8x8x8xf32>, vector<8x8x8xf32>, vector<8x8x8xf32> -> vector<8x8x8xf32>
    "tpu.trace_stop"() : () -> ()
    %cst_17 = arith.constant dense<0xFF800000> : vector<8x8xf32>
    %61 = vector.multi_reduction <maximumf>, %60, %cst_17 [2] : vector<8x8x8xf32> to vector<8x8xf32>
    %62 = vector.shape_cast %61 : vector<8x8xf32> to vector<8x8x1xf32>
    %63 = vector.broadcast %62 : vector<8x8x1xf32> to vector<8x8x8xf32>
    %64 = arith.subf %60, %63 : vector<8x8x8xf32>
    %65 = math.exp %64 : vector<8x8x8xf32>
    %cst_18 = arith.constant dense<0.000000e+00> : vector<8x8xf32>
    %66 = vector.multi_reduction <add>, %65, %cst_18 [2] : vector<8x8x8xf32> to vector<8x8xf32>
    %67 = vector.shape_cast %66 : vector<8x8xf32> to vector<8x8x1xf32>
    %68 = tpu.reciprocal %67 : vector<8x8x1xf32> -> vector<8x8x1xf32>
    %69 = vector.broadcast %68 : vector<8x8x1xf32> to vector<8x8x8xf32>
    %70 = arith.mulf %65, %69 : vector<8x8x8xf32>
    "tpu.trace_start"() <{level = 10 : i32, message = "nqk,nkd->nqd"}> : () -> ()
    %cst_19 = arith.constant dense<0.000000e+00> : vector<8x8x8xf32>
    %71 = tpu.matmul %70, %59, %cst_19 {dimension_numbers = #tpu.dot_dimension_numbers<[2], [1], [1], [2], [0, 0, 0, 1, 1, 2], [0], [0]>} : vector<8x8x8xf32>, vector<8x8x8xf32>, vector<8x8x8xf32> -> vector<8x8x8xf32>
    "tpu.trace_stop"() : () -> ()
    %72 = vector.extract_strided_slice %71 {offsets = [0, 0, 0], sizes = [2, 8, 8], strides = [1, 1, 1]} : vector<8x8x8xf32> to vector<2x8x8xf32>
    %73 = vector.shape_cast %72 : vector<2x8x8xf32> to vector<16x8xf32>
    %74 = vector.extract_strided_slice %71 {offsets = [2, 0, 0], sizes = [2, 8, 8], strides = [1, 1, 1]} : vector<8x8x8xf32> to vector<2x8x8xf32>
    %75 = vector.shape_cast %74 : vector<2x8x8xf32> to vector<16x8xf32>
    %76 = vector.extract_strided_slice %71 {offsets = [4, 0, 0], sizes = [2, 8, 8], strides = [1, 1, 1]} : vector<8x8x8xf32> to vector<2x8x8xf32>
    %77 = vector.shape_cast %76 : vector<2x8x8xf32> to vector<16x8xf32>
    %78 = vector.extract_strided_slice %71 {offsets = [6, 0, 0], sizes = [2, 8, 8], strides = [1, 1, 1]} : vector<8x8x8xf32> to vector<2x8x8xf32>
    %79 = vector.shape_cast %78 : vector<2x8x8xf32> to vector<16x8xf32>
    %80 = tpu.concatenate %73, %75, %77, %79 in 1 : vector<16x8xf32>, vector<16x8xf32>, vector<16x8xf32>, vector<16x8xf32> -> vector<16x32xf32>
    %cst_20 = arith.constant dense<0.000000e+00> : vector<16x32xf32>
    %81 = tpu.matmul %80, %1, %cst_20 {dimension_numbers = #tpu.dot_dimension_numbers<[1], [0], [0], [1], [0, 0, 1, 1], [], []>} : vector<16x32xf32>, vector<32x32xf32>, vector<16x32xf32> -> vector<16x32xf32>
    %82 = arith.addf %9, %81 : vector<16x32xf32>
    %cst_21 = arith.constant dense<0.000000e+00> : vector<16xf32>
    %83 = vector.multi_reduction <add>, %82, %cst_21 [1] : vector<16x32xf32> to vector<16xf32>
    %84 = vector.shape_cast %83 : vector<16xf32> to vector<16x1xf32>
    %cst_22 = arith.constant 3.200000e+01 : f32
    %85 = vector.broadcast %cst_22 : f32 to vector<16x1xf32>
    %86 = arith.divf %84, %85 : vector<16x1xf32>
    %87 = vector.broadcast %86 : vector<16x1xf32> to vector<16x32xf32>
    %88 = arith.subf %82, %87 : vector<16x32xf32>
    %89 = arith.mulf %88, %88 : vector<16x32xf32>
    %cst_23 = arith.constant dense<0.000000e+00> : vector<16xf32>
    %90 = vector.multi_reduction <add>, %89, %cst_23 [1] : vector<16x32xf32> to vector<16xf32>
    %91 = vector.shape_cast %90 : vector<16xf32> to vector<16x1xf32>
    %cst_24 = arith.constant 3.200000e+01 : f32
    %92 = vector.broadcast %cst_24 : f32 to vector<16x1xf32>
    %93 = arith.divf %91, %92 : vector<16x1xf32>
    %94 = vector.broadcast %86 : vector<16x1xf32> to vector<16x32xf32>
    %95 = arith.subf %82, %94 : vector<16x32xf32>
    %cst_25 = arith.constant 9.99999974E-6 : f32
    %96 = vector.broadcast %cst_25 : f32 to vector<16x1xf32>
    %97 = arith.addf %93, %96 : vector<16x1xf32>
    %98 = math.rsqrt %97 : vector<16x1xf32>
    %99 = vector.broadcast %98 : vector<16x1xf32> to vector<16x32xf32>
    %100 = arith.mulf %95, %99 : vector<16x32xf32>
    %101 = vector.broadcast %5 : vector<1x32xf32> to vector<16x32xf32>
    %102 = arith.mulf %100, %101 : vector<16x32xf32>
    %103 = vector.broadcast %6 : vector<1x32xf32> to vector<16x32xf32>
    %104 = arith.addf %102, %103 : vector<16x32xf32>
    %cst_26 = arith.constant dense<0.000000e+00> : vector<16x128xf32>
    %105 = tpu.matmul %104, %2, %cst_26 {dimension_numbers = #tpu.dot_dimension_numbers<[1], [0], [0], [1], [0, 0, 1, 1], [], []>} : vector<16x32xf32>, vector<32x128xf32>, vector<16x128xf32> -> vector<16x128xf32>
    %106 = vector.broadcast %7 : vector<1x128xf32> to vector<16x128xf32>
    %107 = arith.addf %105, %106 : vector<16x128xf32>
    %cst_27 = arith.constant 5.000000e-01 : f32
    %108 = vector.broadcast %cst_27 : f32 to vector<16x128xf32>
    %109 = arith.mulf %108, %107 : vector<16x128xf32>
    %cst_28 = arith.constant 1.41421354 : f32
    %110 = vector.broadcast %cst_28 : f32 to vector<16x128xf32>
    %111 = arith.divf %107, %110 : vector<16x128xf32>
    %112 = math.erf %111 : vector<16x128xf32>
    %cst_29 = arith.constant 1.000000e+00 : f32
    %113 = vector.broadcast %cst_29 : f32 to vector<16x128xf32>
    %114 = arith.addf %113, %112 : vector<16x128xf32>
    %115 = arith.mulf %109, %114 : vector<16x128xf32>
    %c0_30 = arith.constant 0 : index
    %c0_31 = arith.constant 0 : index
    %116 = vector.load %arg2[%c0_30, %c0_31] : memref<128x32xf32, #tpu.memory_space<vmem>>, vector<128x32xf32>
    %cst_32 = arith.constant dense<0.000000e+00> : vector<16x32xf32>
    %117 = tpu.matmul %115, %116, %cst_32 {dimension_numbers = #tpu.dot_dimension_numbers<[1], [0], [0], [1], [0, 0, 1, 1], [], []>} : vector<16x128xf32>, vector<128x32xf32>, vector<16x32xf32> -> vector<16x32xf32>
    %118 = vector.broadcast %8 : vector<1x32xf32> to vector<16x32xf32>
    %119 = arith.addf %117, %118 : vector<16x32xf32>
    %120 = arith.addf %119, %82 : vector<16x32xf32>
    %c0_33 = arith.constant 0 : index
    %c0_34 = arith.constant 0 : index
    %121 = vector.load %arg3[%c0_33, %c0_34] : memref<16x32xf32, #tpu.memory_space<vmem>>, vector<16x32xf32>
    tpu.vector_store %arg3[%c0_33, %c0_34], %120 {strides = array<i32>} : memref<16x32xf32, #tpu.memory_space<vmem>>, vector<16x32xf32>,
    return
  }
}

</mosaic_0001>

<bundles_post_ra>
// kernel: encoder_layer.1
= control target key start
LH: loop header
LB: loop body
LE: loop exit
PB: predicated region body
PF: predicated region fallthrough
CT: control target
= control target key end

     0   :  { %vm31_vm0 = vcmask 261120   ;;  %s2613_s0 = inlined_call_operand.vmem [shape: f32[16,32], index: 0, kind: input, shape index: {}]   ;;  %s2614_s1 = inlined_call_operand.vmem [shape: f32[72,128], index: 1, kind: input, shape index: {}]   ;;  %s2615_s2 = inlined_call_operand.vmem [shape: f32[128,32], index: 2, kind: input, shape index: {}]   ;;  %s2616_s3 = inlined_call_operand.hbm [shape: f32[16,32], index: 3, kind: output, shape index: {}]  }
   0x1   :  { %v2286_v0 = vld [vmem:[%s2613_s0] sm:$0xff]  ;;  %v2291_v1 = vld [vmem:[%s2613_s0 + $0x8] sm:$0xff] }
   0x2   :  { %8 = vsyncpa [#allocation3], 0  ;;  %v32_v2 = vsel %vm31_vm0, %v2286_v0, 0.0  ;;  %v35_v3 = vsel %vm31_vm0, %v2291_v1, 0.0  ;;  %v2304_v14 = vld [vmem:[%s2614_s1] sm:$0xff]  ;;  %v2309_v15 = vld [vmem:[%s2614_s1 + $0x8] sm:$0xff] }
   0x3   :  { %33 = vadd.xlane.f32.xlu0 %v32_v2  ;;  %v2314_v16 = vld [vmem:[%s2614_s1 + $0x10] sm:$0xff]  ;;  %v2172_v17 = vpack.i.bf16 %v2309_v15, %v2304_v14  ;;  %v2103_v18 = vpack.c.bf16 %v2309_v15, %v2304_v14  ;;  %v2323_v19 = vld [vmem:[%s2614_s1 + $0x18] sm:$0xff]  ;;  %v1851_v28 = vld [vmem:[%s2614_s1 + $0x40] ss:$0 sm:$0xff]  ;;  %v2250_v37 = vmov 0.0   ;;  %vm2251_vm1 = vmmov 0  }
   0x4   :  { %v2107_v20 = vpack.c.bf16 %v2323_v19, %v2314_v16  ;;  %v1852_v30 = vld [vmem:[%s2614_s1 + $0x41] ss:$0 sm:$0xff]  ;;  %1976 = vmatprep.subr.mxu0 %v2250_v37  ;;  %1978 = vmatprep.mubr.msk.f32.mxu0 %vm2251_vm1, %v2250_v37  ;;  %s2252_s27 = smov 120   ;;  %s2253_s28 = smov 112   ;;  %vm168_vm2 = vcmask 64512   ;;  %vm1497_vm3 = vcmask 130048  }
   0x5   :  { %2104 = vmatprep.subr.bf16.mxu1 %v2103_v18  ;;  %s2254_s29 = smov 104   ;;  %s2255_s30 = smov 96   ;;  %vm1500_vm4 = vcmask 195584  }
   0x6   :  { %2106 = vmatpush3.bf16.msra.mxu1 %v2103_v18  ;;  %s2256_s4 = smov 64   ;;  %s2257_s5 = smov 32  }
   0x7   :  { %36 = vadd.xlane.f32.xlu0 %v35_v3  ;;  %2108 = vmatprep.subr.bf16.mxu1 %v2107_v20  ;;  %s2258_s6 = smov 8   ;;  %s2259_s7 = smov 16  }
   0x8   :  { %s2260_s8 = smov 24  }
   0xa   :  { %2110 = vmatpush3.bf16.msra.mxu1 %v2107_v20 }
   0xb   :  { %1966 = vmatprep.subr.mxu1 %v2250_v37 }
  0x90   :  { %v34_v4 = vpop.xlane.xlu0 %33 }
  0x91   :  { %v39_v5 = vmul.f32 0.03125, %v34_v4 }
  0x93   :  { %v41_v6 = vsub.f32 %v2286_v0, %v39_v5 }
  0x94   :  { %v37_v7 = vpop.xlane.xlu0 %36 }
  0x95   :  { %v40_v8 = vmul.f32 0.03125, %v37_v7  ;;  %v43_v9 = vmul.f32 %v41_v6, %v41_v6 }
  0x97   :  { %v42_v10 = vsub.f32 %v2291_v1, %v40_v8  ;;  %v45_v11 = vsel %vm31_vm0, %v43_v9, 0.0 }
  0x98   :  { %46 = vadd.xlane.f32.xlu1 %v45_v11 }
  0x99   :  { %v44_v12 = vmul.f32 %v42_v10, %v42_v10 }
  0x9b   :  { %v48_v13 = vsel %vm31_vm0, %v44_v12, 0.0 }
  0x9c   :  { %49 = vadd.xlane.f32.xlu1 %v48_v13 }
 0x125   :  { %v47_v21 = vpop.xlane.xlu1 %46 }
 0x126   :  { %v51_v22 = vmul.f32 0.03125, %v47_v21 }
 0x128   :  { %v53_v23 = vadd.f32 1e-05, %v51_v22 }
 0x129   :  { %v50_v24 = vpop.xlane.xlu1 %49 }
 0x12a   :  { %2182 = vrsqrt.f32 %v53_v23  ;;  %v52_v25 = vmul.f32 0.03125, %v50_v24 }
 0x12c   :  { %v54_v26 = vadd.f32 1e-05, %v52_v25 }
 0x12e   :  { %2184 = vrsqrt.f32 %v54_v26 }
 0x134   :  { %v2183_v27 = vpop.eup %2182 }
 0x135   :  { %v57_v29 = vmul.f32 %v2183_v27, %v41_v6 }
 0x137   :  { %v63_v31 = vmul.f32 %v1851_v28, %v57_v29 }
 0x138   :  { %v2185_v32 = vpop.eup %2184 }
 0x139   :  { %v58_v33 = vmul.f32 %v2185_v32, %v42_v10  ;;  %v69_v34 = vadd.f32 %v1852_v30, %v63_v31 }
 0x13b   :  { %v64_v35 = vmul.f32 %v1851_v28, %v58_v33  ;;  %1963 = vmatprep.mubr.msk.f32.mxu1 %vm31_vm0, %v69_v34 }
 0x13d   :  { %v70_v36 = vadd.f32 %v1852_v30, %v64_v35 }
 0x13f   :  { %1964 = vmatmul.mubr.msk.f32.vlgmr.msra.gmra.mrb[0].mxu1 %vm31_vm0, %v70_v36 }
 0x140   :  { %1968 = vmatprep.mubr.msk.f32.mxu1 %vm2251_vm1, %v2250_v37 }
 0x212   :  { %v2341_v38 = vpop.f32.mrb[0].mxu1 }
 0x213   :  { %156 = vrot.lane.b32.xlu1 %v2341_v38, %s2252_s27  ;;  %v2344_v39 = vpop.f32.mrb[1].mxu1 }
 0x214   :  { %154 = vrot.lane.b32.xlu0 %v2344_v39, %s2252_s27 }
 0x217   :  { %158 = vrot.lane.b32.xlu1 %v2344_v39, %s2253_s28 }
 0x218   :  { %162 = vrot.lane.b32.xlu0 %v2344_v39, %s2254_s29 }
 0x21b   :  { %160 = vrot.lane.b32.xlu1 %v2341_v38, %s2253_s28  ;;  %s2261_s28 = smov [#allocation2]  }
 0x21c   :  { %166 = vrot.lane.b32.xlu0 %v2344_v39, %s2255_s30 }
 0x21f   :  { %164 = vrot.lane.b32.xlu1 %v2341_v38, %s2254_s29  ;;  %s1840_s29 = sshll.u32 %s2261_s28, 4  ;;  %s1841_s29 = int_to_ptr.vmem [resolvable:$true] %s1840_s29 }
 0x220   :  { %p2231_p1 = scmp.lt.s32.totalorder %s1841_s29, %s1841_s29 }
 0x223   :  { %243 = vrot.lane.b32.xlu1 %v2341_v38, %s2255_s30 }
 0x285   :  { %v2353_v40 = vpop.permute.xlu1 %156 }
 0x286   :  { %395 = vrot.lane.b32.xlu1 %v2353_v40, %s2255_s30  ;;  %v2356_v41 = vpop.permute.xlu0 %154 }
 0x287   :  { %319 = vrot.lane.b32.xlu0 %v2356_v41, %s2255_s30 }
 0x289   :  { %v2359_v42 = vpop.permute.xlu1 %158 }
 0x28a   :  { %v2361_v43 = vpop.permute.xlu0 %162 }
 0x28b   :  { %471 = vrot.lane.b32.xlu0 %v2359_v42, %s2255_s30 }
 0x28d   :  { %v2364_v44 = vpop.permute.xlu1 %160 }
 0x28e   :  { %547 = vrot.lane.b32.xlu1 %v2364_v44, %s2255_s30  ;;  %v167_v45 = vpop.permute.xlu0 %166 }
 0x28f   :  { %623 = vrot.lane.b32.xlu0 %v2361_v43, %s2255_s30  ;;  %1967 = vmatpush3.xpose.msk.msra.mxu1 %vm168_vm2, %v167_v45 }
 0x290   :  { %1971 = vmatprep.subr.mxu1 %v2250_v37 }
 0x291   :  { %v2370_v46 = vpop.permute.xlu1 %164 }
 0x292   :  { %699 = vrot.lane.b32.xlu1 %v2370_v46, %s2255_s30  ;;  %1969 = vmatmul.mubr.msk.f32.vlgmr.msra.gmra.mrb[2].mxu1 %vm168_vm2, %v2344_v39  ;;  %s2226_s30 = scalar_lea.vmem %s1841_s29, 256 }
 0x293   :  { %1973 = vmatprep.mubr.msk.f32.mxu1 %vm2251_vm1, %v2250_v37  ;;  %p2227_p0 = scmp.ne.s32.totalorder %s1841_s29, %s2226_s30  ;;  %p2232_p2 = scmp.lt.s32.totalorder %s2226_s30, %s2226_s30 }
 0x295   :  { %v244_v47 = vpop.permute.xlu1 %243  ;;  %p2233_p3 = por %p2232_p2, %p2231_p1 }
 0x296   :  { %1972 = vmatpush3.xpose.msk.msra.mxu1 %vm168_vm2, %v244_v47 }
 0x297   :  { %1981 = vmatprep.subr.mxu1 %v2250_v37  ;;  %p2234_p4 = pnand %p2233_p3, %p2227_p0 }
 0x299   :  { %1974 = vmatmul.mubr.msk.f32.vlgmr.msra.gmra.mrb[4].mxu1 %vm168_vm2, %v2341_v38 }
 0x29a   :  { %1983 = vmatprep.mubr.msk.f32.mxu1 %vm2251_vm1, %v2250_v37 }
 0x2f8   :  { %v396_v48 = vpop.permute.xlu1 %395 }
 0x2f9   :  { %1982 = vmatpush3.xpose.msk.msra.mxu1 %vm168_vm2, %v396_v48  ;;  %v320_v49 = vpop.permute.xlu0 %319 }
 0x2fa   :  { %1977 = vmatpush3.xpose.msk.msra.mxu0 %vm168_vm2, %v320_v49  ;;  %1991 = vmatprep.subr.mxu1 %v2250_v37 }
 0x2fb   :  { %1986 = vmatprep.subr.mxu0 %v2250_v37 }
 0x2fc   :  { %1984 = vmatmul.mubr.msk.f32.vlgmr.msra.gmra.mrb[6].mxu1 %vm168_vm2, %v2353_v40 }
 0x2fd   :  { %1979 = vmatmul.mubr.msk.f32.vlgmr.msra.gmra.mrb[0].mxu0 %vm168_vm2, %v2356_v41  ;;  %v472_v50 = vpop.permute.xlu0 %471  ;;  %1993 = vmatprep.mubr.msk.f32.mxu1 %vm2251_vm1, %v2250_v37 }
 0x2fe   :  { %1987 = vmatpush3.xpose.msk.msra.mxu0 %vm168_vm2, %v472_v50  ;;  %1988 = vmatprep.mubr.msk.f32.mxu0 %vm2251_vm1, %v2250_v37 }
 0x2ff   :  { %1996 = vmatprep.subr.mxu0 %v2250_v37 }
 0x300   :  { %v548_v51 = vpop.permute.xlu1 %547 }
 0x301   :  { %1989 = vmatmul.mubr.msk.f32.vlgmr.msra.gmra.mrb[2].mxu0 %vm168_vm2, %v2359_v42  ;;  %1992 = vmatpush3.xpose.msk.msra.mxu1 %vm168_vm2, %v548_v51  ;;  %v624_v52 = vpop.permute.xlu0 %623 }
 0x302   :  { %1997 = vmatpush3.xpose.msk.msra.mxu0 %vm168_vm2, %v624_v52  ;;  %1998 = vmatprep.mubr.msk.f32.mxu0 %vm2251_vm1, %v2250_v37 }
 0x303   :  { %2001 = vmatprep.subr.mxu1 %v2250_v37  ;;  %2006 = vmatprep.subr.mxu0 %v2250_v37 }
 0x304   :  { %v700_v53 = vpop.permute.xlu1 %699  ;;  %1994 = vmatmul.mubr.msk.f32.vlgmr.msra.gmra.mrb[8].mxu1 %vm168_vm2, %v2364_v44 }
 0x305   :  { %1999 = vmatmul.mubr.msk.f32.vlgmr.msra.gmra.mrb[4].mxu0 %vm168_vm2, %v2361_v43  ;;  %2002 = vmatpush3.xpose.msk.msra.mxu1 %vm168_vm2, %v700_v53 }
 0x306   :  { %2003 = vmatprep.mubr.msk.f32.mxu1 %vm2251_vm1, %v2250_v37  ;;  %2011 = vmatprep.subr.mxu1 %v2250_v37 }
 0x307   :  { %2008 = vmatprep.mubr.msk.f32.mxu0 %vm2251_vm1, %v2250_v37 }
 0x308   :  { %2004 = vmatmul.mubr.msk.f32.vlgmr.msra.gmra.mrb[10].mxu1 %vm168_vm2, %v2370_v46 }
 0x309   :  { %2013 = vmatprep.mubr.msk.f32.mxu1 %vm2251_vm1, %v2250_v37 }
 0x365   :  { %v239_v54 = vpop.f32.mrb[2].mxu1 }
 0x366   :  { %v1970_v55 = vpop.f32.mrb[3].mxu1  ;;  %v775_v56 = vsel %vm168_vm2, %v239_v54, -inf }
 0x367   :  { %776 = vmax.xlane.f32.xlu0 %v775_v56 }
 0x36c   :  { %v315_v57 = vpop.f32.mrb[4].mxu1 }
 0x36d   :  { %v1975_v58 = vpop.f32.mrb[5].mxu1  ;;  %v778_v59 = vsel %vm168_vm2, %v315_v57, -inf }
 0x36e   :  { %779 = vmax.xlane.f32.xlu1 %v778_v59 }
 0x3cf   :  { %v467_v60 = vpop.f32.mrb[6].mxu1 }
 0x3d0   :  { %v391_v61 = vpop.f32.mrb[0].mxu0  ;;  %v1985_v62 = vpop.f32.mrb[7].mxu1  ;;  %v784_v63 = vsel %vm168_vm2, %v467_v60, -inf }
 0x3d1   :  { %785 = vmax.xlane.f32.xlu0 %v784_v63  ;;  %v1980_v2 = vpop.f32.mrb[1].mxu0  ;;  %v781_v4 = vsel %vm168_vm2, %v391_v61, -inf }
 0x3d4   :  { %v543_v3 = vpop.f32.mrb[2].mxu0 }
 0x3d5   :  { %782 = vmax.xlane.f32.xlu0 %v781_v4  ;;  %v1990_v5 = vpop.f32.mrb[3].mxu0  ;;  %v787_v10 = vsel %vm168_vm2, %v543_v3, -inf }
 0x3d7   :  { %v619_v6 = vpop.f32.mrb[8].mxu1 }
 0x3d8   :  { %v1995_v7 = vpop.f32.mrb[9].mxu1  ;;  %v695_v8 = vpop.f32.mrb[4].mxu0  ;;  %v790_v9 = vsel %vm168_vm2, %v619_v6, -inf }
 0x3d9   :  { %791 = vmax.xlane.f32.xlu1 %v790_v9  ;;  %788 = vmax.xlane.f32.xlu0 %v787_v10  ;;  %v2000_v11 = vpop.f32.mrb[5].mxu0  ;;  %v793_v20 = vsel %vm168_vm2, %v695_v8, -inf }
 0x3db   :  { %v771_v12 = vpop.f32.mrb[10].mxu1 }
 0x3dc   :  { %v2005_v13 = vpop.f32.mrb[11].mxu1  ;;  %v796_v18 = vsel %vm168_vm2, %v771_v12, -inf }
 0x3dd   :  { %797 = vmax.xlane.f32.xlu1 %v796_v18  ;;  %794 = vmax.xlane.f32.xlu0 %v793_v20 }
 0x3ee   :  { %939 = vrot.lane.b32.xlu1 %v2341_v38, %s2256_s4 }
 0x3f2   :  { %1015 = vrot.lane.b32.xlu1 %v2356_v41, %s2256_s4 }
 0x3f3   :  { %863 = vrot.lane.b32.xlu0 %v2344_v39, %s2256_s4 }
 0x3f4   :  { %v777_v21 = vpop.xlane.xlu0 %776 }
 0x3f5   :  { %v799_v22 = vsub.f32 %v239_v54, %v777_v21 }
 0x3f6   :  { %1091 = vrot.lane.b32.xlu1 %v2353_v40, %s2256_s4 }
 0x3f7   :  { %1167 = vrot.lane.b32.xlu0 %v2359_v42, %s2256_s4  ;;  %v807_v23 = vmul.f32 1.442695, %v799_v22 }
 0x3f9   :  { %2186 = vpow2.f32 %v807_v23 }
 0x3fa   :  { %1243 = vrot.lane.b32.xlu1 %v2364_v44, %s2256_s4 }
 0x3fb   :  { %v780_v24 = vpop.xlane.xlu1 %779 }
 0x3fc   :  { %v800_v25 = vsub.f32 %v315_v57, %v780_v24 }
 0x3fe   :  { %v809_v26 = vmul.f32 1.442695, %v800_v25 }
 0x400   :  { %2188 = vpow2.f32 %v809_v26 }
 0x403   :  { %v2439_v27 = vpop.eup %2186 }
 0x404   :  { %v823_v28 = vsel %vm168_vm2, %v2439_v27, 0.0 }
 0x40a   :  { %v2443_v29 = vpop.eup %2188 }
 0x40b   :  { %v826_v30 = vsel %vm168_vm2, %v2443_v29, 0.0 }
 0x416   :  { %824 = vadd.xlane.f32.xlu0 %v823_v28 }
 0x41e   :  { %827 = vadd.xlane.f32.xlu1 %v826_v30 }
 0x45e   :  { %v786_v31 = vpop.xlane.xlu0 %785 }
 0x45f   :  { %v802_v32 = vsub.f32 %v467_v60, %v786_v31 }
 0x461   :  { %v813_v33 = vmul.f32 1.442695, %v802_v32 }
 0x462   :  { %v783_v34 = vpop.xlane.xlu0 %782 }
 0x463   :  { %2190 = vpow2.f32 %v813_v33  ;;  %v801_v35 = vsub.f32 %v391_v61, %v783_v34 }
 0x465   :  { %v811_v36 = vmul.f32 1.442695, %v801_v35 }
 0x466   :  { %v792_v38 = vpop.xlane.xlu1 %791  ;;  %v789_v39 = vpop.xlane.xlu0 %788 }
 0x467   :  { %2192 = vpow2.f32 %v811_v36  ;;  %v804_v40 = vsub.f32 %v619_v6, %v792_v38  ;;  %v803_v41 = vsub.f32 %v543_v3, %v789_v39 }
 0x469   :  { %v817_v42 = vmul.f32 1.442695, %v804_v40  ;;  %v815_v44 = vmul.f32 1.442695, %v803_v41 }
 0x46a   :  { %v798_v45 = vpop.xlane.xlu1 %797  ;;  %v795_v47 = vpop.xlane.xlu0 %794 }
 0x46b   :  { %2194 = vpow2.f32 %v817_v42  ;;  %v806_v48 = vsub.f32 %v771_v12, %v798_v45  ;;  %v805_v49 = vsub.f32 %v695_v8, %v795_v47 }
 0x46c   :  { %2196 = vpow2.f32 %v815_v44 }
 0x46d   :  { %v2191_v50 = vpop.eup %2190  ;;  %v821_v51 = vmul.f32 1.442695, %v806_v48  ;;  %v819_v52 = vmul.f32 1.442695, %v805_v49 }
 0x46e   :  { %v940_v53 = vpop.permute.xlu1 %939  ;;  %v864_v54 = vpop.permute.xlu0 %863  ;;  %v832_v55 = vsel %vm168_vm2, %v2191_v50, 0.0 }
 0x46f   :  { %2198 = vpow2.f32 %v821_v51  ;;  %2012 = vmatpush3.msra.mxu1 %v940_v53  ;;  %833 = vadd.xlane.f32.xlu1 %v832_v55 }
 0x470   :  { %2200 = vpow2.f32 %v819_v52  ;;  %2007 = vmatpush3.msra.mxu0 %v864_v54  ;;  %2021 = vmatprep.subr.mxu1 %v2250_v37 }
 0x471   :  { %v2193_v56 = vpop.eup %2192  ;;  %2016 = vmatprep.subr.mxu0 %v2250_v37 }
 0x472   :  { %v829_v57 = vsel %vm168_vm2, %v2193_v56, 0.0  ;;  %v1016_v4 = vpop.permute.xlu1 %1015  ;;  %v1168_v5 = vpop.permute.xlu0 %1167 }
 0x473   :  { %830 = vadd.xlane.f32.xlu0 %v829_v57 }
 0x475   :  { %v2195_v58 = vpop.eup %2194 }
 0x476   :  { %v2451_v59 = vpop.eup %2196  ;;  %v838_v60 = vsel %vm168_vm2, %v2195_v58, 0.0  ;;  %v1092_v6 = vpop.permute.xlu1 %1091 }
 0x477   :  { %839 = vadd.xlane.f32.xlu1 %v838_v60  ;;  %v835_v61 = vsel %vm168_vm2, %v2451_v59, 0.0 }
 0x478   :  { %836 = vadd.xlane.f32.xlu0 %v835_v61 }
 0x479   :  { %v2456_v62 = vpop.eup %2198 }
 0x47a   :  { %v2458_v63 = vpop.eup %2200  ;;  %v844_v2 = vsel %vm168_vm2, %v2456_v62, 0.0  ;;  %v1244_v8 = vpop.permute.xlu1 %1243 }
 0x47b   :  { %845 = vadd.xlane.f32.xlu1 %v844_v2  ;;  %v841_v3 = vsel %vm168_vm2, %v2458_v63, 0.0 }
 0x47c   :  { %842 = vadd.xlane.f32.xlu0 %v841_v3 }
 0x48c   :  { %1395 = vrot.lane.b32.xlu1 %v2370_v46, %s2256_s4 }
 0x492   :  { %1319 = vrot.lane.b32.xlu0 %v2361_v43, %s2256_s4 }
 0x496   :  { %2173 = vrot.lane.b32.xlu0 %v2172_v17, %s2257_s5 }
 0x4a3   :  { %v825_v7 = vpop.xlane.xlu0 %824 }
 0x4a4   :  { %2202 = vrcp.f32 %v825_v7 }
 0x4ab   :  { %v828_v9 = vpop.xlane.xlu1 %827 }
 0x4ac   :  { %2204 = vrcp.f32 %v828_v9 }
 0x4ae   :  { %v2203_v10 = vpop.eup %2202 }
 0x4af   :  { %v855_v11 = vmul.f32 %v2203_v10, %v2439_v27  ;;  %v2177_v27 = vpack.i.bf16 %v2323_v19, %v2314_v16 }
 0x4b1   :  { %2009 = vmatmul.mubr.msk.f32.vlgmr.msra.gmra.mrb[6].mxu0 %vm168_vm2, %v855_v11  ;;  %2178 = vrot.lane.b32.xlu1 %v2177_v27, %s2257_s5  ;;  %v20_v27 = vld [vmem:[%s2614_s1 + $0x28] sm:$0xff] }
 0x4b2   :  { %2017 = vmatpush3.msra.mxu0 %v1016_v4  ;;  %2018 = vmatprep.mubr.msk.f32.mxu0 %vm2251_vm1, %v2250_v37 }
 0x4b3   :  { %2026 = vmatprep.subr.mxu0 %v2250_v37 }
 0x4b6   :  { %v2205_v43 = vpop.eup %2204 }
 0x4b7   :  { %v856_v46 = vmul.f32 %v2205_v43, %v2443_v29 }
 0x4b9   :  { %2014 = vmatmul.mubr.msk.f32.vlgmr.msra.gmra.mrb[12].mxu1 %vm168_vm2, %v856_v46 }
 0x4ba   :  { %2022 = vmatpush3.msra.mxu1 %v1092_v6  ;;  %2023 = vmatprep.mubr.msk.f32.mxu1 %vm2251_vm1, %v2250_v37 }
 0x4bb   :  { %2031 = vmatprep.subr.mxu1 %v2250_v37 }
 0x4fc   :  { %v834_v12 = vpop.xlane.xlu1 %833 }
 0x4fd   :  { %2206 = vrcp.f32 %v834_v12 }
 0x500   :  { %v831_v13 = vpop.xlane.xlu0 %830 }
 0x501   :  { %2208 = vrcp.f32 %v831_v13 }
 0x504   :  { %v840_v18 = vpop.xlane.xlu1 %839 }
 0x505   :  { %2210 = vrcp.f32 %v840_v18  ;;  %v837_v20 = vpop.xlane.xlu0 %836 }
 0x506   :  { %2212 = vrcp.f32 %v837_v20 }
 0x507   :  { %v2207_v21 = vpop.eup %2206 }
 0x508   :  { %v858_v22 = vmul.f32 %v2207_v21, %v2191_v50  ;;  %v846_v23 = vpop.xlane.xlu1 %845 }
 0x509   :  { %2214 = vrcp.f32 %v846_v23  ;;  %v843_v24 = vpop.xlane.xlu0 %842 }
 0x50a   :  { %2216 = vrcp.f32 %v843_v24  ;;  %2024 = vmatmul.mubr.msk.f32.vlgmr.msra.gmra.mrb[14].mxu1 %vm168_vm2, %v858_v22 }
 0x50b   :  { %v2209_v25 = vpop.eup %2208  ;;  %2032 = vmatpush3.msra.mxu1 %v1244_v8  ;;  %2033 = vmatprep.mubr.msk.f32.mxu1 %vm2251_vm1, %v2250_v37 }
 0x50c   :  { %v857_v26 = vmul.f32 %v2209_v25, %v2193_v56  ;;  %2041 = vmatprep.subr.mxu1 %v2250_v37  ;;  %v1396_v16 = vpop.permute.xlu1 %1395 }
 0x50d   :  { %v1320_v32 = vpop.permute.xlu0 %1319 }
 0x50e   :  { %2019 = vmatmul.mubr.msk.f32.vlgmr.msra.gmra.mrb[8].mxu0 %vm168_vm2, %v857_v26  ;;  %v19_v26 = vld [vmem:[%s2614_s1 + $0x20] sm:$0xff] }
 0x50f   :  { %v2211_v28 = vpop.eup %2210  ;;  %2027 = vmatpush3.msra.mxu0 %v1168_v5  ;;  %2028 = vmatprep.mubr.msk.f32.mxu0 %vm2251_vm1, %v2250_v37 }
 0x510   :  { %v2213_v29 = vpop.eup %2212  ;;  %v860_v30 = vmul.f32 %v2211_v28, %v2195_v58  ;;  %2036 = vmatprep.subr.mxu0 %v2250_v37  ;;  %v2119_v28 = vpack.c.bf16 %v20_v27, %v19_v26 }
 0x511   :  { %v859_v31 = vmul.f32 %v2213_v29, %v2451_v59  ;;  %v2174_v33 = vpop.permute.xlu0 %2173  ;;  %v21_v29 = vld [vmem:[%s2614_s1 + $0x30] sm:$0xff] }
 0x512   :  { %2034 = vmatmul.mubr.msk.f32.vlgmr.msra.gmra.mrb[16].mxu1 %vm168_vm2, %v860_v30  ;;  %v2176_v34 = vunpack.i.h.bf16 %v2174_v33  ;;  %v2175_v35 = vunpack.i.l.bf16 %v2174_v33  ;;  %v22_v30 = vld [vmem:[%s2614_s1 + $0x38] sm:$0xff]  ;;  %v1740_v33 = vld [vmem:[%s2615_s2 + $0x20] sm:$0xff] }
 0x513   :  { %v2215_v19 = vpop.eup %2214  ;;  %2029 = vmatmul.mubr.msk.f32.vlgmr.msra.gmra.mrb[10].mxu0 %vm168_vm2, %v859_v31  ;;  %2042 = vmatpush3.msra.mxu1 %v1396_v16  ;;  %v2123_v31 = vpack.c.bf16 %v22_v30, %v21_v29  ;;  %v1736_v16 = vld [vmem:[%s2615_s2] sm:$0xff] }
 0x514   :  { %v2217_v14 = vpop.eup %2216  ;;  %v862_v15 = vmul.f32 %v2215_v19, %v2456_v62  ;;  %2037 = vmatpush3.msra.mxu0 %v1320_v32  ;;  %2038 = vmatprep.mubr.msk.f32.mxu0 %vm2251_vm1, %v2250_v37  ;;  %v2111_v40 = vpack.c.bf16 %v2176_v34, %v2175_v35  ;;  %v1737_v19 = vld [vmem:[%s2615_s2 + $0x8] sm:$0xff]  ;;  %v1738_v32 = vld [vmem:[%s2615_s2 + $0x10] sm:$0xff] }
 0x515   :  { %v861_v17 = vmul.f32 %v2217_v14, %v2458_v63  ;;  %2043 = vmatprep.mubr.msk.f32.mxu1 %vm2251_vm1, %v2250_v37  ;;  %v2127_v14 = vpack.c.bf16 %v1737_v19, %v1736_v16  ;;  %v1741_v34 = vld [vmem:[%s2615_s2 + $0x28] sm:$0xff] }
 0x516   :  { %2044 = vmatmul.mubr.msk.f32.vlgmr.msra.gmra.mrb[18].mxu1 %vm168_vm2, %v862_v15  ;;  %2112 = vmatprep.subr.bf16.mxu1 %v2111_v40  ;;  %v1739_v15 = vld [vmem:[%s2615_s2 + $0x18] sm:$0xff]  ;;  %v2135_v35 = vpack.c.bf16 %v1741_v34, %v1740_v33 }
 0x517   :  { %2039 = vmatmul.mubr.msk.f32.vlgmr.msra.gmra.mrb[12].mxu0 %vm168_vm2, %v861_v17  ;;  %2114 = vmatpush3.bf16.msra.mxu1 %v2111_v40  ;;  %v2131_v17 = vpack.c.bf16 %v1739_v15, %v1738_v32 }
 0x518   :  { %2128 = vmatprep.subr.bf16.mxu0 %v2127_v14 }
 0x519   :  { %2130 = vmatpush3.bf16.msra.mxu0 %v2127_v14 }
 0x51a   :  { %2132 = vmatprep.subr.bf16.mxu0 %v2131_v17 }
 0x51d   :  { %2134 = vmatpush3.bf16.msra.mxu0 %v2131_v17 }
 0x51e   :  { %2136 = vmatprep.subr.bf16.mxu0 %v2135_v35 }
 0x521   :  { %2138 = vmatpush3.bf16.msra.mxu0 %v2135_v35 }
 0x523   :  { %v2179_v36 = vpop.permute.xlu1 %2178 }
 0x524   :  { %v2181_v38 = vunpack.i.h.bf16 %v2179_v36  ;;  %v2180_v39 = vunpack.i.l.bf16 %v2179_v36 }
 0x526   :  { %v2115_v44 = vpack.c.bf16 %v2181_v38, %v2180_v39 }
 0x528   :  { %2116 = vmatprep.subr.bf16.mxu1 %v2115_v44 }
 0x529   :  { %2118 = vmatpush3.bf16.msra.mxu1 %v2115_v44 }
 0x52a   :  { %2120 = vmatprep.subr.bf16.mxu1 %v2119_v28 }
 0x584   :  { %v935_v41 = vpop.f32.mrb[6].mxu0 }
 0x585   :  { %v2010_v42 = vpop.f32.mrb[7].mxu0 }
 0x58c   :  { %v1011_v45 = vpop.f32.mrb[12].mxu1 }
 0x58d   :  { %v2015_v37 = vpop.f32.mrb[13].mxu1 }
 0x5dd   :  { %v1163_v47 = vpop.f32.mrb[14].mxu1 }
 0x5de   :  { %1475 = vrot.lane.b32.xlu1 %v1163_v47, %s2258_s6  ;;  %v2025_v48 = vpop.f32.mrb[15].mxu1  ;;  %v1882_v47 = vld [vmem:[%s2614_s1 + $0x43] ss:$0 sm:$0xff] }
 0x5e1   :  { %v1087_v49 = vpop.f32.mrb[8].mxu0 }
 0x5e2   :  { %1473 = vrot.lane.b32.xlu0 %v1087_v49, %s2258_s6  ;;  %v2020_v50 = vpop.f32.mrb[9].mxu0 }
 0x5e5   :  { %v1315_v51 = vpop.f32.mrb[16].mxu1 }
 0x5e6   :  { %v1239_v52 = vpop.f32.mrb[10].mxu0  ;;  %1483 = vrot.lane.b32.xlu1 %v1315_v51, %s2259_s7  ;;  %v2035_v53 = vpop.f32.mrb[17].mxu1 }
 0x5e7   :  { %1481 = vrot.lane.b32.xlu0 %v1239_v52, %s2259_s7  ;;  %v2030_v54 = vpop.f32.mrb[11].mxu0 }
 0x5e8   :  { %v1742_v54 = vld [vmem:[%s2615_s2 + $0x30] sm:$0xff] }
 0x5e9   :  { %v1467_v55 = vpop.f32.mrb[18].mxu1 }
 0x5ea   :  { %v1391_v56 = vpop.f32.mrb[12].mxu0  ;;  %1491 = vrot.lane.b32.xlu1 %v1467_v55, %s2260_s8  ;;  %v2045_v57 = vpop.f32.mrb[19].mxu1  ;;  %v1743_v55 = vld [vmem:[%s2615_s2 + $0x38] sm:$0xff] }
 0x5eb   :  { %1489 = vrot.lane.b32.xlu0 %v1391_v56, %s2260_s8  ;;  %v2040_v58 = vpop.f32.mrb[13].mxu0  ;;  %v2139_v56 = vpack.c.bf16 %v1743_v55, %v1742_v54  ;;  %v1744_v57 = vld [vmem:[%s2615_s2 + $0x40] sm:$0xff] }
 0x5ec   :  { %v1745_v58 = vld [vmem:[%s2615_s2 + $0x48] sm:$0xff] }
 0x5ed   :  { %2140 = vmatprep.subr.bf16.mxu0 %v2139_v56 }
 0x5ee   :  { %2142 = vmatpush3.bf16.msra.mxu0 %v2139_v56 }
 0x650   :  { %v1476_v59 = vpop.permute.xlu1 %1475 }
 0x651   :  { %v1496_v63 = vsel %vm168_vm2, %v1011_v45, %v1476_v59  ;;  %v1881_v45 = vld [vmem:[%s2614_s1 + $0x42] ss:$0 sm:$0xff]  ;;  %v2143_v59 = vpack.c.bf16 %v1745_v58, %v1744_v57 }
 0x653   :  { %2144 = vmatprep.subr.bf16.mxu0 %v2143_v59 }
 0x654   :  { %v1474_v60 = vpop.permute.xlu0 %1473  ;;  %2146 = vmatpush3.bf16.msra.mxu0 %v2143_v59 }
 0x655   :  { %v1495_v2 = vsel %vm168_vm2, %v935_v41, %v1474_v60  ;;  %v1746_v60 = vld [vmem:[%s2615_s2 + $0x50] sm:$0xff] }
 0x658   :  { %v1484_v61 = vpop.permute.xlu1 %1483 }
 0x659   :  { %v1482_v62 = vpop.permute.xlu0 %1481  ;;  %v1499_v3 = vsel %vm1497_vm3, %v1496_v63, %v1484_v61  ;;  %v1747_v61 = vld [vmem:[%s2615_s2 + $0x58] sm:$0xff]  ;;  %v1748_v63 = vld [vmem:[%s2615_s2 + $0x60] sm:$0xff] }
 0x65a   :  { %v1498_v5 = vsel %vm1497_vm3, %v1495_v2, %v1482_v62  ;;  %v2147_v62 = vpack.c.bf16 %v1747_v61, %v1746_v60  ;;  %v1749_v2 = vld [vmem:[%s2615_s2 + $0x68] sm:$0xff] }
 0x65c   :  { %v1492_v4 = vpop.permute.xlu1 %1491  ;;  %2148 = vmatprep.subr.bf16.mxu0 %v2147_v62 }
 0x65d   :  { %v1502_v6 = vsel %vm1500_vm4, %v1499_v3, %v1492_v4  ;;  %v1490_v7 = vpop.permute.xlu0 %1489  ;;  %2150 = vmatpush3.bf16.msra.mxu0 %v2147_v62  ;;  %v2151_v3 = vpack.c.bf16 %v1749_v2, %v1748_v63  ;;  %v1750_v4 = vld [vmem:[%s2615_s2 + $0x70] sm:$0xff] }
 0x65e   :  { %v1501_v8 = vsel %vm1500_vm4, %v1498_v5, %v1490_v7  ;;  %v1751_v5 = vld [vmem:[%s2615_s2 + $0x78] sm:$0xff]  ;;  %v1883_v7 = vld [vmem:[%s2614_s1 + $0x44] ss:$0 sm:$0xff] }
 0x65f   :  { %2054 = vmatprep.mubr.msk.f32.mxu1 %vm31_vm0, %v1501_v8  ;;  %2152 = vmatprep.subr.bf16.mxu0 %v2151_v3 }
 0x660   :  { %2055 = vmatmul.mubr.msk.f32.vlgmr.msra.gmra.mrb[20].mxu1 %vm31_vm0, %v1502_v6  ;;  %v2155_v6 = vpack.c.bf16 %v1751_v5, %v1750_v4 }
 0x661   :  { %2122 = vmatpush3.bf16.msra.mxu1 %v2119_v28  ;;  %2154 = vmatpush3.bf16.msra.mxu0 %v2151_v3 }
 0x662   :  { %2124 = vmatprep.subr.bf16.mxu1 %v2123_v31  ;;  %2156 = vmatprep.subr.bf16.mxu0 %v2155_v6 }
 0x665   :  { %2126 = vmatpush3.bf16.msra.mxu1 %v2123_v31  ;;  %2158 = vmatpush3.bf16.msra.mxu0 %v2155_v6 }
 0x733   :  { %v2056_v9 = vpop.f32.mrb[20].mxu1 }
 0x734   :  { %v2509_v10 = vadd.f32 %v2056_v9, %v2291_v1  ;;  %v1591_v11 = vpop.f32.mrb[21].mxu1 }
 0x735   :  { %v2512_v43 = vadd.f32 %v1591_v11, %v2286_v0 }
 0x736   :  { %v1605_v46 = vsel %vm31_vm0, %v2509_v10, 0.0 }
 0x737   :  { %1606 = vadd.xlane.f32.xlu1 %v1605_v46  ;;  %v1602_v12 = vsel %vm31_vm0, %v2512_v43, 0.0 }
 0x738   :  { %1603 = vadd.xlane.f32.xlu0 %v1602_v12 }
 0x7c4   :  { %v1607_v13 = vpop.xlane.xlu1 %1606 }
 0x7c5   :  { %v1609_v18 = vmul.f32 0.03125, %v1607_v13  ;;  %v1604_v20 = vpop.xlane.xlu0 %1603 }
 0x7c6   :  { %v1608_v21 = vmul.f32 0.03125, %v1604_v20 }
 0x7c7   :  { %v1611_v22 = vsub.f32 %v2509_v10, %v1609_v18 }
 0x7c8   :  { %v1610_v1 = vsub.f32 %v2512_v43, %v1608_v21 }
 0x7c9   :  { %v1613_v24 = vmul.f32 %v1611_v22, %v1611_v22 }
 0x7ca   :  { %v1612_v23 = vmul.f32 %v1610_v1, %v1610_v1 }
 0x7cb   :  { %v1617_v25 = vsel %vm31_vm0, %v1613_v24, 0.0 }
 0x7cc   :  { %v1614_v0 = vsel %vm31_vm0, %v1612_v23, 0.0 }
 0x7cd   :  { %1615 = vadd.xlane.f32.xlu0 %v1614_v0 }
 0x7d1   :  { %1618 = vadd.xlane.f32.xlu0 %v1617_v25  ;;  %v1886_v25 = vld [vmem:[%s2614_s1 + $0x45] ss:$0 sm:$0xff] }
 0x85a   :  { %v1616_v36 = vpop.xlane.xlu0 %1615 }
 0x85b   :  { %v1620_v38 = vmul.f32 0.03125, %v1616_v36 }
 0x85d   :  { %v1622_v39 = vadd.f32 1e-05, %v1620_v38 }
 0x85e   :  { %v1619_v40 = vpop.xlane.xlu0 %1618 }
 0x85f   :  { %2218 = vrsqrt.f32 %v1622_v39  ;;  %v1621_v41 = vmul.f32 0.03125, %v1619_v40 }
 0x861   :  { %v1623_v42 = vadd.f32 1e-05, %v1621_v41 }
 0x863   :  { %2220 = vrsqrt.f32 %v1623_v42 }
 0x869   :  { %v2219_v44 = vpop.eup %2218 }
 0x86a   :  { %v1626_v37 = vmul.f32 %v2219_v44, %v1610_v1 }
 0x86c   :  { %v1632_v48 = vmul.f32 %v1881_v45, %v1626_v37 }
 0x86d   :  { %v2221_v49 = vpop.eup %2220 }
 0x86e   :  { %v1627_v50 = vmul.f32 %v2221_v49, %v1611_v22  ;;  %v1638_v51 = vadd.f32 %v1882_v47, %v1632_v48 }
 0x870   :  { %v1633_v52 = vmul.f32 %v1881_v45, %v1627_v50  ;;  %2065 = vmatprep.mubr.msk.f32.mxu1 %vm31_vm0, %v1638_v51 }
 0x872   :  { %v1639_v53 = vadd.f32 %v1882_v47, %v1633_v52 }
 0x874   :  { %2066 = vmatmul.mubr.msk.f32.vlgmr.msra.gmra.mrb[22].mxu1 %vm31_vm0, %v1639_v53 }
 0x947   :  { %v2067_v8 = vpop.f32.mrb[22].mxu1 }
 0x948   :  { %v1722_v9 = vadd.f32 %v2067_v8, %v1883_v7  ;;  %v1716_v11 = vpop.f32.mrb[23].mxu1 }
 0x949   :  { %v1717_v46 = vadd.f32 %v1883_v7, %v1716_v11 }
 0x94a   :  { %v1729_v12 = vmul.f32 0.70710677, %v1722_v9  ;;  %v1726_v23 = vmul.f32 0.5, %v1722_v9 }
 0x94b   :  { %v1728_v13 = vmul.f32 0.70710677, %v1717_v46  ;;  %v1725_v22 = vmul.f32 0.5, %v1717_v46 }
 0x94c   :  { %2222 = verf.f32 %v1729_v12 }
 0x94d   :  { %2224 = verf.f32 %v1728_v13 }
 0x956   :  { %v2223_v18 = vpop.eup %2222 }
 0x957   :  { %v2225_v20 = vpop.eup %2224  ;;  %v1733_v21 = vadd.f32 1.0, %v2223_v18 }
 0x958   :  { %v1732_v1 = vadd.f32 1.0, %v2225_v20 }
 0x959   :  { %v1735_v24 = vmul.f32 %v1733_v21, %v1726_v23 }
 0x95a   :  { %v1734_v0 = vmul.f32 %v1732_v1, %v1725_v22 }
 0x95c   :  { %2100 = vmatprep.mubr.f32.mxu0 %v1734_v0 }
 0x95d   :  { %2101 = vmatmul.mubr.f32.vlgmr.msra.gmra.mrb[14].mxu0 %v1735_v24 }
 0xa30   :  { %v2102_v26 = vpop.f32.mrb[14].mxu0 }
 0xa31   :  { %v1828_v27 = vadd.f32 %v2102_v26, %v1886_v25  ;;  %v1822_v28 = vpop.f32.mrb[15].mxu0 }
 0xa32   :  { %v1823_v29 = vadd.f32 %v1886_v25, %v1822_v28 }
 0xa33   :  { %v1832_v30 = vadd.f32 %v1828_v27, %v2509_v10 }
 0xa34   :  { %v1831_v31 = vadd.f32 %v1823_v29, %v2512_v43 }
 0xa35   :  { %1834 = vst.msk [vmem:[#allocation2 + $0x8] sm:$0xff] %vm31_vm0, %v1832_v30 }
 0xa36   :  { %1833 = vst.msk [vmem:[#allocation2] sm:$0xff] %vm31_vm0, %v1831_v31 }
 0xa37   :  { %2237 = shalt.err (!%p2234_p4)
}
 0xa38   :  { %s2238_s5 = scalar_lea.hbm %s2616_s3, 256 }
 0xa39   :  { %p2239_p5 = scmp.ne.s32.totalorder %s2616_s3, %s2238_s5  ;;  %p2242_p6 = scmp.lt.u32.totalorder %s2238_s5, %s2616_s3 }
 0xa3b   :  { %p2244_p7 = pnand %p2242_p6, %p2239_p5 }
 0xa3d   :  { %2247 = shalt.err (!%p2244_p7)
}
 0xa3e   :  { %s2262_s11 = smov 128  }
 0xa3f   :  { %1846 = dma.vmem_to_hbm [thread:$0]  %s1841_s29, 256, %s2616_s3, [#allocation3], %s2262_s11, %s2262_s11, %s2258_s6  }
 0xa40   :  { %2248 = dma.done.wait [#allocation3], 256  }
 0xa41   :  { %2249 = vsyncadd [#allocation3], 4294967040 }
 0xa42   :  { %1850 = vsyncpa [#allocation3], 1 }

</bundles_post_ra>
